<compile_context>
chip_gen: v7x
topology: tpu7x:2x2x1
jax: 0.10.0
libtpu: 0.0.40
codegen_flags: <defaults>
</compile_context>

<pallas_src>
import functools

import jax
import jax.numpy as jnp
from jax.experimental import pallas as pl
from jax.experimental.pallas import tpu as pltpu

IN_FEATURES = 784
NUM_CLASSES = 10

N1 = 256   # fc1 out
N2 = 128   # fc2 out
N3 = 128   # fc3 out: 64  -> 128 (zero-padded columns)
N4 = 128   # fc4 out: 10  -> 128 (padded columns carry a -inf bias)


def _round_up(x, m):
    return (x + m - 1) // m * m


def _mlp_kernel(x_ref,
                w1_ref, b1_ref,
                w2_ref, b2_ref,
                w3_ref, b3_ref,
                w4_ref, b4_ref,
                o_ref):
    # Cast the f32 input tile to bf16 in vregs (VPU), then run the MXU chain.
    x = x_ref[...].astype(jnp.bfloat16)

    # fc1 + ReLU  (bf16 MXU matmul over K=784, f32 accumulate)
    h = jnp.dot(x, w1_ref[...], preferred_element_type=jnp.float32)
    h = jnp.maximum(h + b1_ref[...], 0.0).astype(jnp.bfloat16)
    # fc2 + ReLU
    h = jnp.dot(h, w2_ref[...], preferred_element_type=jnp.float32)
    h = jnp.maximum(h + b2_ref[...], 0.0).astype(jnp.bfloat16)
    # fc3 + ReLU (padded columns stay exactly 0: zero weights + zero bias)
    h = jnp.dot(h, w3_ref[...], preferred_element_type=jnp.float32)
    h = jnp.maximum(h + b3_ref[...], 0.0).astype(jnp.bfloat16)
    # fc4 logits; padded columns become -inf via the bias
    logits = jnp.dot(h, w4_ref[...], preferred_element_type=jnp.float32)
    logits = logits + b4_ref[...]

    # Numerically stable log_softmax over the 128-wide slab.
    # -inf padded columns contribute exp(-inf)=0, so the result is exact.
    m = jnp.max(logits, axis=1, keepdims=True)
    shifted = logits - m
    lse = jnp.log(jnp.sum(jnp.exp(shifted), axis=1, keepdims=True))
    o_ref[...] = (shifted - lse).astype(o_ref.dtype)


def init_params(key):
    """Deterministic init mimicking nn.Linear's U(-1/sqrt(fan_in), +1/sqrt(fan_in)).

    Logical (unpadded, f32) params: weights stored transposed as (in, out),
    biases as (1, out). Used for packing and for the f32 reference."""
    dims = [(784, 256), (256, 128), (128, 64), (64, 10)]
    params = {}
    keys = jax.random.split(key, 2 * len(dims))
    for i, (fan_in, fan_out) in enumerate(dims):
        bound = 1.0 / jnp.sqrt(fan_in)
        w = jax.random.uniform(keys[2 * i], (fan_in, fan_out),
                               minval=-bound, maxval=bound, dtype=jnp.float32)
        b = jax.random.uniform(keys[2 * i + 1], (1, fan_out),
                               minval=-bound, maxval=bound, dtype=jnp.float32)
        params[f"w{i + 1}"] = w
        params[f"b{i + 1}"] = b
    return params


def pack_params(params):
    """Pad fc3/fc4 to lane-aligned widths and cast weights to bf16 (biases f32)."""
    w1 = params["w1"]                                                    # (784, 256)
    w2 = params["w2"]                                                    # (256, 128)
    w3 = jnp.zeros((N2, N3), jnp.float32).at[:, :64].set(params["w3"])  # (128, 128)
    w4 = jnp.zeros((N3, N4), jnp.float32).at[:64, :NUM_CLASSES].set(params["w4"])

    b1 = params["b1"]  # (1, 256)
    b2 = params["b2"]  # (1, 128)
    b3 = jnp.zeros((1, N3), jnp.float32).at[:, :64].set(params["b3"])
    # -inf on padded logit columns keeps max / logsumexp exact.
    b4 = jnp.full((1, N4), -jnp.inf, jnp.float32).at[:, :NUM_CLASSES].set(params["b4"])

    return {
        "w1": w1.astype(jnp.bfloat16), "b1": b1,
        "w2": w2.astype(jnp.bfloat16), "b2": b2,
        "w3": w3.astype(jnp.bfloat16), "b3": b3,
        "w4": w4.astype(jnp.bfloat16), "b4": b4,
    }


def _pick_tile_b(B):
    # >= 2 grid programs once B >= 16 (v7x has 2 TensorCores to feed), capped
    # at 1024 rows so the x double-buffer stays ~6 MiB of VMEM.
    return max(8, min(1024, _round_up(pl.cdiv(B, 2), 8)))


@functools.partial(jax.jit, static_argnames=("tile_b", "out_dtype"))
def classifier_forward(x, packed, *, tile_b=None, out_dtype=jnp.float32):
    """x: (B, ...) float32, flattened to (B, 784); packed: output of pack_params."""
    B = x.shape[0]
    x = x.reshape(B, -1)                       # free reshape, no HBM pass
    assert x.shape[1] == IN_FEATURES

    if tile_b is None:
        tile_b = _pick_tile_b(B)
    Bp = _round_up(B, tile_b)
    if Bp != B:
        x = jnp.pad(x, ((0, Bp - B), (0, 0)))  # only when B isn't a tile multiple

    grid = (Bp // tile_b,)
    batch_map = lambda i: (i, 0)
    const_map = lambda i: (0, 0)               # weights / biases stay VMEM-resident

    in_specs = [
        pl.BlockSpec((tile_b, IN_FEATURES), batch_map),   # f32 x, unpadded K=784
        pl.BlockSpec((IN_FEATURES, N1), const_map), pl.BlockSpec((1, N1), const_map),
        pl.BlockSpec((N1, N2), const_map), pl.BlockSpec((1, N2), const_map),
        pl.BlockSpec((N2, N3), const_map), pl.BlockSpec((1, N3), const_map),
        pl.BlockSpec((N3, N4), const_map), pl.BlockSpec((1, N4), const_map),
    ]
    out_spec = pl.BlockSpec((tile_b, N4), batch_map)

    mac_elems = IN_FEATURES * N1 + N1 * N2 + N2 * N3 + N3 * N4
    weight_bytes = 2 * mac_elems                      # bf16 weights
    bias_bytes = 4 * (N1 + N2 + N3 + N4)              # f32 biases
    out_bytes = Bp * N4 * jnp.dtype(out_dtype).itemsize
    cost = pl.CostEstimate(
        flops=2 * Bp * mac_elems,
        transcendentals=Bp * N4,                      # exp in log_softmax
        bytes_accessed=Bp * IN_FEATURES * 4 + weight_bytes + bias_bytes + out_bytes,
    )

    out = pl.pallas_call(
        _mlp_kernel,
        out_shape=jax.ShapeDtypeStruct((Bp, N4), out_dtype),
        grid=grid,
        in_specs=in_specs,
        out_specs=out_spec,
        compiler_params=pltpu.CompilerParams(
            dimension_semantics=("parallel",),
            vmem_limit_bytes=32 * 1024 * 1024,
        ),
        cost_estimate=cost,
    )(x,
      packed["w1"], packed["b1"],
      packed["w2"], packed["b2"],
      packed["w3"], packed["b3"],
      packed["w4"], packed["b4"])

    # Strip batch padding and the padded (-inf) logit columns.
    return out[:B, :NUM_CLASSES]


def reference_forward(x, params):
    """Plain-JAX f32 reference (unpadded weights)."""
    h = jnp.maximum(x @ params["w1"] + params["b1"], 0.0)
    h = jnp.maximum(h @ params["w2"] + params["b2"], 0.0)
    h = jnp.maximum(h @ params["w3"] + params["b3"], 0.0)
    logits = h @ params["w4"] + params["b4"]
    return jax.nn.log_softmax(logits, axis=1)


if __name__ == "__main__":
    key = jax.random.PRNGKey(0)
    k_params, k_x = jax.random.split(key)

    params = init_params(k_params)
    packed = pack_params(params)

    # Small MNIST-like batch: (B, 1, 28, 28), flattened as in the PyTorch forward.
    # B=32 exercises the 2-program grid path (tile_b=16).
    B = 32
    x_img = jax.random.normal(k_x, (B, 1, 28, 28), dtype=jnp.float32)

    out = classifier_forward(x_img, packed)
    out = jax.block_until_ready(out)

    ref = reference_forward(x_img.reshape(B, -1), params)
    assert out.shape == (B, NUM_CLASSES)
    # bf16 matmul inputs vs f32 reference -> loosened tolerance.
    max_diff = jnp.max(jnp.abs(out - ref))
    assert jnp.allclose(out, ref, atol=5e-2, rtol=5e-2), (
        f"mismatch vs reference, max abs diff = {max_diff}")

    print("KERNEL_OK")
</pallas_src>

<mosaic_0001>
module attributes {stable_mosaic.version = 11 : i64} {
  func.func @_mlp_kernel(%arg0: i32, %arg1: memref<16x784xf32, #tpu.memory_space<vmem>>, %arg2: memref<784x256xbf16, #tpu.memory_space<vmem>>, %arg3: memref<1x256xf32, #tpu.memory_space<vmem>>, %arg4: memref<256x128xbf16, #tpu.memory_space<vmem>>, %arg5: memref<1x128xf32, #tpu.memory_space<vmem>>, %arg6: memref<128x128xbf16, #tpu.memory_space<vmem>>, %arg7: memref<1x128xf32, #tpu.memory_space<vmem>>, %arg8: memref<128x128xbf16, #tpu.memory_space<vmem>>, %arg9: memref<1x128xf32, #tpu.memory_space<vmem>>, %arg10: memref<16x128xf32, #tpu.memory_space<vmem>>) attributes {dimension_semantics = [#tpu.dimension_semantics<parallel>], iteration_bounds = array<i64: 2>, scalar_prefetch = 0 : i64, scratch_operands = 0 : i64, tpu.core_type = #tpu.core_type<tc>, window_params = [{transform_indices = @transform_0, window_bounds = array<i64: 16, 784>}, {pipeline_mode = #tpu.pipeline_mode<synchronous>, transform_indices = @transform_1, window_bounds = array<i64: 784, 256>}, {pipeline_mode = #tpu.pipeline_mode<synchronous>, transform_indices = @transform_2, window_bounds = array<i64: 1, 256>}, {pipeline_mode = #tpu.pipeline_mode<synchronous>, transform_indices = @transform_3, window_bounds = array<i64: 256, 128>}, {pipeline_mode = #tpu.pipeline_mode<synchronous>, transform_indices = @transform_4, window_bounds = array<i64: 1, 128>}, {pipeline_mode = #tpu.pipeline_mode<synchronous>, transform_indices = @transform_5, window_bounds = array<i64: 128, 128>}, {pipeline_mode = #tpu.pipeline_mode<synchronous>, transform_indices = @transform_6, window_bounds = array<i64: 1, 128>}, {pipeline_mode = #tpu.pipeline_mode<synchronous>, transform_indices = @transform_7, window_bounds = array<i64: 128, 128>}, {pipeline_mode = #tpu.pipeline_mode<synchronous>, transform_indices = @transform_8, window_bounds = array<i64: 1, 128>}, {transform_indices = @transform_9, window_bounds = array<i64: 16, 128>}]} {
    %c0 = arith.constant 0 : index
    %c0_0 = arith.constant 0 : index
    %0 = vector.load %arg1[%c0, %c0_0] : memref<16x784xf32, #tpu.memory_space<vmem>>, vector<16x784xf32>
    %1 = arith.truncf %0 : vector<16x784xf32> to vector<16x784xbf16>
    %c0_1 = arith.constant 0 : index
    %c0_2 = arith.constant 0 : index
    %2 = vector.load %arg2[%c0_1, %c0_2] : memref<784x256xbf16, #tpu.memory_space<vmem>>, vector<784x256xbf16>
    %cst = arith.constant dense<0.000000e+00> : vector<16x256xf32>
    %3 = tpu.matmul %1, %2, %cst {dimension_numbers = #tpu.dot_dimension_numbers<[1], [0], [0], [1], [0, 0, 1, 1], [], []>} : vector<16x784xbf16>, vector<784x256xbf16>, vector<16x256xf32> -> vector<16x256xf32>
    %c0_3 = arith.constant 0 : index
    %c0_4 = arith.constant 0 : index
    %4 = vector.load %arg3[%c0_3, %c0_4] : memref<1x256xf32, #tpu.memory_space<vmem>>, vector<1x256xf32>
    %5 = vector.broadcast %4 : vector<1x256xf32> to vector<16x256xf32>
    %6 = arith.addf %3, %5 : vector<16x256xf32>
    %cst_5 = arith.constant 0.000000e+00 : f32
    %7 = vector.broadcast %cst_5 : f32 to vector<16x256xf32>
    %8 = arith.maximumf %6, %7 : vector<16x256xf32>
    %9 = arith.truncf %8 : vector<16x256xf32> to vector<16x256xbf16>
    %c0_6 = arith.constant 0 : index
    %c0_7 = arith.constant 0 : index
    %10 = vector.load %arg4[%c0_6, %c0_7] : memref<256x128xbf16, #tpu.memory_space<vmem>>, vector<256x128xbf16>
    %cst_8 = arith.constant dense<0.000000e+00> : vector<16x128xf32>
    %11 = tpu.matmul %9, %10, %cst_8 {dimension_numbers = #tpu.dot_dimension_numbers<[1], [0], [0], [1], [0, 0, 1, 1], [], []>} : vector<16x256xbf16>, vector<256x128xbf16>, vector<16x128xf32> -> vector<16x128xf32>
    %c0_9 = arith.constant 0 : index
    %c0_10 = arith.constant 0 : index
    %12 = vector.load %arg5[%c0_9, %c0_10] : memref<1x128xf32, #tpu.memory_space<vmem>>, vector<1x128xf32>
    %13 = vector.broadcast %12 : vector<1x128xf32> to vector<16x128xf32>
    %14 = arith.addf %11, %13 : vector<16x128xf32>
    %cst_11 = arith.constant 0.000000e+00 : f32
    %15 = vector.broadcast %cst_11 : f32 to vector<16x128xf32>
    %16 = arith.maximumf %14, %15 : vector<16x128xf32>
    %17 = arith.truncf %16 : vector<16x128xf32> to vector<16x128xbf16>
    %c0_12 = arith.constant 0 : index
    %c0_13 = arith.constant 0 : index
    %18 = vector.load %arg6[%c0_12, %c0_13] : memref<128x128xbf16, #tpu.memory_space<vmem>>, vector<128x128xbf16>
    %cst_14 = arith.constant dense<0.000000e+00> : vector<16x128xf32>
    %19 = tpu.matmul %17, %18, %cst_14 {dimension_numbers = #tpu.dot_dimension_numbers<[1], [0], [0], [1], [0, 0, 1, 1], [], []>} : vector<16x128xbf16>, vector<128x128xbf16>, vector<16x128xf32> -> vector<16x128xf32>
    %c0_15 = arith.constant 0 : index
    %c0_16 = arith.constant 0 : index
    %20 = vector.load %arg7[%c0_15, %c0_16] : memref<1x128xf32, #tpu.memory_space<vmem>>, vector<1x128xf32>
    %21 = vector.broadcast %20 : vector<1x128xf32> to vector<16x128xf32>
    %22 = arith.addf %19, %21 : vector<16x128xf32>
    %cst_17 = arith.constant 0.000000e+00 : f32
    %23 = vector.broadcast %cst_17 : f32 to vector<16x128xf32>
    %24 = arith.maximumf %22, %23 : vector<16x128xf32>
    %25 = arith.truncf %24 : vector<16x128xf32> to vector<16x128xbf16>
    %c0_18 = arith.constant 0 : index
    %c0_19 = arith.constant 0 : index
    %26 = vector.load %arg8[%c0_18, %c0_19] : memref<128x128xbf16, #tpu.memory_space<vmem>>, vector<128x128xbf16>
    %cst_20 = arith.constant dense<0.000000e+00> : vector<16x128xf32>
    %27 = tpu.matmul %25, %26, %cst_20 {dimension_numbers = #tpu.dot_dimension_numbers<[1], [0], [0], [1], [0, 0, 1, 1], [], []>} : vector<16x128xbf16>, vector<128x128xbf16>, vector<16x128xf32> -> vector<16x128xf32>
    %c0_21 = arith.constant 0 : index
    %c0_22 = arith.constant 0 : index
    %28 = vector.load %arg9[%c0_21, %c0_22] : memref<1x128xf32, #tpu.memory_space<vmem>>, vector<1x128xf32>
    %29 = vector.broadcast %28 : vector<1x128xf32> to vector<16x128xf32>
    %30 = arith.addf %27, %29 : vector<16x128xf32>
    %cst_23 = arith.constant dense<0xFF800000> : vector<16xf32>
    %31 = vector.multi_reduction <maximumf>, %30, %cst_23 [1] : vector<16x128xf32> to vector<16xf32>
    %32 = vector.shape_cast %31 : vector<16xf32> to vector<16x1xf32>
    %33 = vector.broadcast %32 : vector<16x1xf32> to vector<16x128xf32>
    %34 = arith.subf %30, %33 : vector<16x128xf32>
    %35 = math.exp %34 : vector<16x128xf32>
    %cst_24 = arith.constant dense<0.000000e+00> : vector<16xf32>
    %36 = vector.multi_reduction <add>, %35, %cst_24 [1] : vector<16x128xf32> to vector<16xf32>
    %37 = vector.shape_cast %36 : vector<16xf32> to vector<16x1xf32>
    %38 = math.log %37 : vector<16x1xf32>
    %39 = vector.broadcast %38 : vector<16x1xf32> to vector<16x128xf32>
    %40 = arith.subf %34, %39 : vector<16x128xf32>
    %c0_25 = arith.constant 0 : index
    %c0_26 = arith.constant 0 : index
    %41 = vector.load %arg10[%c0_25, %c0_26] : memref<16x128xf32, #tpu.memory_space<vmem>>, vector<16x128xf32>
    tpu.vector_store %arg10[%c0_25, %c0_26], %40 {strides = array<i32>} : memref<16x128xf32, #tpu.memory_space<vmem>>, vector<16x128xf32>,
    return
  }
  func.func @transform_0(%arg0: i32) -> (i32, i32) {
    %c0_i32 = arith.constant 0 : i32
    %c0_i32_0 = arith.constant 0 : i32
    return %arg0, %c0_i32 : i32, i32
  }
  func.func @transform_1(%arg0: i32) -> (i32, i32) {
    %c0_i32 = arith.constant 0 : i32
    %c0_i32_0 = arith.constant 0 : i32
    %c0_i32_1 = arith.constant 0 : i32
    return %c0_i32, %c0_i32_0 : i32, i32
  }
  func.func @transform_2(%arg0: i32) -> (i32, i32) {
    %c0_i32 = arith.constant 0 : i32
    %c0_i32_0 = arith.constant 0 : i32
    %c0_i32_1 = arith.constant 0 : i32
    return %c0_i32, %c0_i32_0 : i32, i32
  }
  func.func @transform_3(%arg0: i32) -> (i32, i32) {
    %c0_i32 = arith.constant 0 : i32
    %c0_i32_0 = arith.constant 0 : i32
    %c0_i32_1 = arith.constant 0 : i32
    return %c0_i32, %c0_i32_0 : i32, i32
  }
  func.func @transform_4(%arg0: i32) -> (i32, i32) {
    %c0_i32 = arith.constant 0 : i32
    %c0_i32_0 = arith.constant 0 : i32
    %c0_i32_1 = arith.constant 0 : i32
    return %c0_i32, %c0_i32_0 : i32, i32
  }
  func.func @transform_5(%arg0: i32) -> (i32, i32) {
    %c0_i32 = arith.constant 0 : i32
    %c0_i32_0 = arith.constant 0 : i32
    %c0_i32_1 = arith.constant 0 : i32
    return %c0_i32, %c0_i32_0 : i32, i32
  }
  func.func @transform_6(%arg0: i32) -> (i32, i32) {
    %c0_i32 = arith.constant 0 : i32
    %c0_i32_0 = arith.constant 0 : i32
    %c0_i32_1 = arith.constant 0 : i32
    return %c0_i32, %c0_i32_0 : i32, i32
  }
  func.func @transform_7(%arg0: i32) -> (i32, i32) {
    %c0_i32 = arith.constant 0 : i32
    %c0_i32_0 = arith.constant 0 : i32
    %c0_i32_1 = arith.constant 0 : i32
    return %c0_i32, %c0_i32_0 : i32, i32
  }
  func.func @transform_8(%arg0: i32) -> (i32, i32) {
    %c0_i32 = arith.constant 0 : i32
    %c0_i32_0 = arith.constant 0 : i32
    %c0_i32_1 = arith.constant 0 : i32
    return %c0_i32, %c0_i32_0 : i32, i32
  }
  func.func @transform_9(%arg0: i32) -> (i32, i32) {
    %c0_i32 = arith.constant 0 : i32
    %c0_i32_0 = arith.constant 0 : i32
    return %arg0, %c0_i32 : i32, i32
  }
}

</mosaic_0001>

<bundles_post_ra>
// kernel: classifier_forward.1
= control target key start
LH: loop header
LB: loop body
LE: loop exit
PB: predicated region body
PF: predicated region fallthrough
CT: control target
= control target key end

     0   :  { %14 = vsyncpa [#allocation3], 0  ;;  %s2885_s0 = inlined_call_operand.vmem [shape: f32[32,784], index: 0, kind: input, shape index: {}]   ;;  %s2886_s1 = inlined_call_operand.vmem [shape: bf16[784,256], index: 1, kind: input, shape index: {}]   ;;  %s2887_s2 = inlined_call_operand.vmem [shape: f32[1,256], index: 2, kind: input, shape index: {}]   ;;  %s2888_s3 = inlined_call_operand.vmem [shape: bf16[256,128], index: 3, kind: input, shape index: {}]   ;;  %s2889_s4 = inlined_call_operand.hbm [shape: f32[1,128], index: 4, kind: input, shape index: {}]   ;;  %s2890_s5 = inlined_call_operand.vmem [shape: bf16[128,128], index: 5, kind: input, shape index: {}]   ;;  %s2891_s6 = inlined_call_operand.hbm [shape: f32[1,128], index: 6, kind: input, shape index: {}]   ;;  %s2892_s7 = inlined_call_operand.vmem [shape: bf16[128,128], index: 7, kind: input, shape index: {}]   ;;  %s2893_s8 = inlined_call_operand.hbm [shape: f32[1,128], index: 8, kind: input, shape index: {}]   ;;  %s2894_s9 = inlined_call_operand.vmem [shape: f32[32,128], index: 9, kind: output, shape index: {}]  }
   0x1   :  { %15 = vsyncpa [#allocation5], 0  ;;  %s2329_s30 = smov 0  }
   0x2 LB: > { %s1696_s10 = sadd.s32 4294967295, %s2271_s30   ;;  %p1698_p0 = scmp.ge.s32.totalorder %s2271_s30, 1  ;;  %s2271_s30 = sphi %s2329_s30, %s21_s30  }
   0x3   : > { %p246_p1 = scmp.lt.s32.totalorder %s2271_s30, 3  ;;  %p2339_p2 = scmp.eq.s32.totalorder %s1696_s10, 0 }
   0x4   : > { %s2273_s13 = smov [#allocation4]   ;;  %s2274_s15 = smov [#allocation2]  }
   0x5   : > { %s2898_s11 = scalar_select %p2339_p2, 1, 0 }
   0x6   : > { %p2343_p3 = pnand %p1698_p0, %p246_p1  ;;  %s282_s14 = sshll.u32 %s2273_s13, 4  ;;  %s283_s14 = int_to_ptr.vmem [resolvable:$true] %s282_s14 }
   0x7   : > { %s268_s16 = sshll.u32 %s2274_s15, 4  ;;  %s2275_s17 = smov [#allocation6]   ;;  %s2355_s16 = int_to_ptr.vmem [resolvable:$true] %s268_s16 }
   0x8   : > { %s2899_s12 = scalar_select %p2343_p3, 1, 0 }
   0x9   : > { %p1956_p4 = pneg %p2343_p3  ;;  %s296_s18 = sshll.u32 %s2275_s17, 4  ;;  %s2357_s18 = int_to_ptr.vmem [resolvable:$true] %s296_s18 }
   0xa   : > { %s2173_s22 = scalar_lea.hbm %s2891_s6, 16 }
   0xb   : > { %p2351_p5 = pnand %p2339_p2, %p1956_p4  ;;  %p2174_p6 = scmp.ne.s32.totalorder %s2891_s6, %s2173_s22 }
   0xc   : > { %p2180_p10 = scmp.lt.u32.totalorder %s2173_s22, %s2891_s6 }
   0xd   : > { %p2367_p7 = pneg %p2351_p5 }
   0xf   : > { %p2176_p8 = pnand %p2367_p7, %p2174_p6 }
  0x11   : > { %p2177_p9 = pneg %p2176_p8 }
  0x13   : > { %p2182_p11 = pnand %p2180_p10, %p2177_p9 }
  0x15   : > { %2185 = shalt.err (!%p2182_p11)
}
  0x16   : > { %s2186_s28 = scalar_lea.vmem %s283_s14, 16  ;;  %s2193_s29 = scalar_lea.vmem %s283_s14, 32 }
  0x17   : > { %p2187_p12 = scmp.ne.s32.totalorder %s283_s14, %s2186_s28  ;;  %p2194_p1 = scmp.lt.s32.totalorder %s283_s14, %s283_s14 }
  0x18   : > { %p2195_p4 = scmp.lt.s32.totalorder %s2193_s29, %s2186_s28 }
  0x19   : > { %p2189_p13 = pnand %p2187_p12, %p2367_p7 }
  0x1a   : > { %p2196_p2 = por %p2195_p4, %p2194_p1 }
  0x1b   : > { %p2190_p0 = pneg %p2189_p13 }
  0x1d   : > { %p2197_p3 = pnand %p2196_p2, %p2190_p0 }
  0x1f   : > { %2200 = shalt.err (!%p2197_p3)
}
  0x20   : > { %1962 = dma.hbm_to_vmem [thread:$0]  (!%p2351_p5), %s2891_s6, 16, %s283_s14, [#allocation5]  }
  0x21   : > { %s2201_s21 = scalar_lea.hbm %s2889_s4, 16 }
  0x22   : > { %p2202_p6 = scmp.ne.s32.totalorder %s2889_s4, %s2201_s21  ;;  %p2208_p2 = scmp.lt.u32.totalorder %s2201_s21, %s2889_s4 }
  0x24   : > { %p2204_p8 = pnand %p2202_p6, %p2367_p7 }
  0x26   : > { %p2205_p9 = pneg %p2204_p8 }
  0x28   : > { %p2210_p3 = pnand %p2208_p2, %p2205_p9 }
  0x2a   : > { %2213 = shalt.err (!%p2210_p3)
}
  0x2b   : > { %s2214_s14 = scalar_lea.vmem %s2355_s16, 16  ;;  %s2221_s27 = scalar_lea.vmem %s2355_s16, 32 }
  0x2c   : > { %p2215_p10 = scmp.ne.s32.totalorder %s2355_s16, %s2214_s14  ;;  %p2222_p13 = scmp.lt.s32.totalorder %s2355_s16, %s2355_s16 }
  0x2d   : > { %p2223_p0 = scmp.lt.s32.totalorder %s2221_s27, %s2214_s14 }
  0x2e   : > { %p2217_p11 = pnand %p2215_p10, %p2367_p7 }
  0x2f   : > { %p2224_p1 = por %p2223_p0, %p2222_p13 }
  0x30   : > { %p2218_p12 = pneg %p2217_p11 }
  0x32   : > { %p2225_p4 = pnand %p2224_p1, %p2218_p12 }
  0x34   : > { %2228 = shalt.err (!%p2225_p4)
}
  0x35   : > { %1959 = dma.hbm_to_vmem [thread:$0]  (!%p2351_p5), %s2889_s4, 16, %s2355_s16, [#allocation3]  }
  0x36   : > { %s2229_s17 = scalar_lea.hbm %s2893_s8, 16 }
  0x37   : > { %p2230_p6 = scmp.ne.s32.totalorder %s2893_s8, %s2229_s17  ;;  %p2236_p2 = scmp.lt.u32.totalorder %s2229_s17, %s2893_s8 }
  0x39   : > { %p2232_p8 = pnand %p2230_p6, %p2367_p7 }
  0x3b   : > { %p2233_p9 = pneg %p2232_p8 }
  0x3d   : > { %p2238_p3 = pnand %p2236_p2, %p2233_p9 }
  0x3f   : > { %2241 = shalt.err (!%p2238_p3)
}
  0x40   : > { %s2242_s16 = scalar_lea.vmem %s2357_s18, 16  ;;  %s2249_s24 = scalar_lea.vmem %s2357_s18, 32 }
  0x41   : > { %p2243_p10 = scmp.ne.s32.totalorder %s2357_s18, %s2242_s16  ;;  %p2250_p13 = scmp.lt.s32.totalorder %s2357_s18, %s2357_s18 }
  0x42   : > { %p2251_p0 = scmp.lt.s32.totalorder %s2249_s24, %s2242_s16 }
  0x43   : > { %p2245_p11 = pnand %p2243_p10, %p2367_p7 }
  0x44   : > { %p2252_p1 = por %p2251_p0, %p2250_p13 }
  0x45   : > { %p2246_p12 = pneg %p2245_p11 }
  0x47   : > { %p2253_p4 = pnand %p2252_p1, %p2246_p12 }
  0x49   : > { %2256 = shalt.err (!%p2253_p4)
}
  0x4a   : > { %1965 = dma.hbm_to_vmem [thread:$0]  (!%p2351_p5), %s2893_s8, 16, %s2357_s18, [#allocation5]  }
  0x4b   : > { %p2902_p6 = scmp.ne.s32.totalorder %s2899_s12, 0 }
  0x4c   : > { %p2903_p7 = scmp.ne.s32.totalorder (!%p2902_p6), %s2898_s11, 0 }
  0x4d   : > { %319 = sbr.rel (%p2902_p6) target bundleno = 1426 (0x592), region = 56 }
  0x54   : > { %2262 = dma.done.wait (%p2903_p7), [#allocation3], 16  }
  0x55   : > { %2264 = vsyncadd (%p2903_p7), [#allocation3], 4294967280 }
  0x56   : > { %2266 = dma.done.wait (%p2903_p7), [#allocation5], 32  }
  0x57   : > { %2268 = vsyncadd (%p2903_p7), [#allocation5], 4294967264  ;;  %v1986_v0 = vld [vmem:[%s2886_s1 + $0x104] ss:$8 sps:$4 sm:$0xff]   ;;  %v1988_v1 = vld [vmem:[%s2886_s1 + $0x100] ss:$8 sps:$4 sm:$0xff]  }
  0x58   : > { %1046 = vmatprep.subr.bf16.mxu0 %v1986_v0  ;;  %v1989_v2 = vld [vmem:[%s2886_s1 + $0x114] ss:$8 sps:$4 sm:$0xff]   ;;  %v1991_v3 = vld [vmem:[%s2886_s1 + $0x110] ss:$8 sps:$4 sm:$0xff]   ;;  %s1707_s11 = sshll.u32 %s1696_s10, 1  ;;  %vm999_vm0 = vcmask 130048  }
  0x59   : > { %1047 = vmatpush1.bf16.msra.mxu0 %v1988_v1  ;;  %v1992_v4 = vld [vmem:[%s2886_s1 + $0x124] ss:$8 sps:$4 sm:$0xff]   ;;  %p365_p5 = scmp.lt.s32.totalorder %s1707_s11, 3  ;;  %v1994_v5 = vld [vmem:[%s2886_s1 + $0x120] ss:$8 sps:$4 sm:$0xff]   ;;  %vm2278_vm1 = vmmov 0  }
  0x5a   : > { %1048 = vmatprep.subr.bf16.mxu0 %v1989_v2  ;;  %v1995_v6 = vld [vmem:[%s2886_s1 + $0x134] ss:$8 sps:$4 sm:$0xff]   ;;  %v1997_v7 = vld [vmem:[%s2886_s1 + $0x130] ss:$8 sps:$4 sm:$0xff]   ;;  %v1998_v8 = vld [vmem:[%s2886_s1 + $0x144] ss:$8 sps:$4 sm:$0xff]  }
  0x5b   : > { %s2905_s11 = smov (!%p365_p5, %s1707_s11), 3  ;;  %v2000_v9 = vld [vmem:[%s2886_s1 + $0x140] ss:$8 sps:$4 sm:$0xff]   ;;  %v2001_v10 = vld [vmem:[%s2886_s1 + $0x154] ss:$8 sps:$4 sm:$0xff]  }
  0x5c   : > { %s1943_s14 = smul.u32 56, %s2905_s11  ;;  %v2003_v11 = vld [vmem:[%s2886_s1 + $0x150] ss:$8 sps:$4 sm:$0xff]   ;;  %v2004_v12 = vld [vmem:[%s2886_s1 + $0x164] ss:$8 sps:$4 sm:$0xff]   ;;  %s1710_s20 = sshll.u32 %s2905_s11, 3 }
  0x5d   : > { %1049 = vmatpush1.bf16.msra.mxu0 %v1991_v3  ;;  %v2006_v16 = vld [vmem:[%s2886_s1 + $0x160] ss:$8 sps:$4 sm:$0xff]   ;;  %v2007_v17 = vld [vmem:[%s2886_s1 + $0x174] ss:$8 sps:$4 sm:$0xff]   ;;  %v2040_v18 = vld [vmem:[%s2886_s1 + $0x4] ss:$8 sps:$4 sm:$0xff]   ;;  %s375_s23 = scalar_lea.vmem %s2894_s9, %s1710_s20 }
  0x5e   : > { %1050 = vmatprep.subr.bf16.mxu0 %v1992_v4  ;;  %s2482_s29 = scalar_lea.vmem %s2885_s0, %s1943_s14  ;;  %v2009_v19 = vld [vmem:[%s2886_s1 + $0x170] ss:$8 sps:$4 sm:$0xff]   ;;  %v2010_v20 = vld [vmem:[%s2886_s1 + $0x184] ss:$8 sps:$4 sm:$0xff]   ;;  %v2045_v21 = vld [vmem:[%s2886_s1] ss:$8 sps:$4 sm:$0xff]   ;;  %1003 = vmatprep.subr.bf16.mxu1 %v2040_v18 }
  0x5f   : > { %v381_v13 = vld [vmem:[%s2482_s29 + $0x18] sm:$0xff]  ;;  %v388_v14 = vld [vmem:[%s2482_s29 + $0x50] sm:$0xff]  ;;  %1004 = vmatpush1.bf16.msra.mxu1 %v2045_v21  ;;  %v2012_v23 = vld [vmem:[%s2886_s1 + $0x180] ss:$8 sps:$4 sm:$0xff]  }
  0x60   : > { %v395_v15 = vpack.c.bf16 %v388_v14, %v381_v13  ;;  %v2046_v22 = vld [vmem:[%s2886_s1 + $0x14] ss:$8 sps:$4 sm:$0xff]   ;;  %v2051_v24 = vld [vmem:[%s2886_s1 + $0x10] ss:$8 sps:$4 sm:$0xff]   ;;  %v2052_v25 = vld [vmem:[%s2886_s1 + $0x24] ss:$8 sps:$4 sm:$0xff]  }
  0x61   : > { %1051 = vmatpush1.bf16.msra.mxu0 %v1994_v5  ;;  %1005 = vmatprep.subr.bf16.mxu1 %v2046_v22  ;;  %v2013_v26 = vld [vmem:[%s2886_s1 + $0x194] ss:$8 sps:$4 sm:$0xff]   ;;  %v2057_v27 = vld [vmem:[%s2886_s1 + $0x20] ss:$8 sps:$4 sm:$0xff]   ;;  %v2015_v29 = vld [vmem:[%s2886_s1 + $0x190] ss:$8 sps:$4 sm:$0xff]  }
  0x62   : > { %1052 = vmatprep.subr.bf16.mxu0 %v1995_v6  ;;  %1078 = vmatprep.mubr.bf16.mxu0 %v395_v15  ;;  %v2058_v28 = vld [vmem:[%s2886_s1 + $0x34] ss:$8 sps:$4 sm:$0xff]   ;;  %v2016_v30 = vld [vmem:[%s2886_s1 + $0x1a4] ss:$8 sps:$4 sm:$0xff]   ;;  %v2063_v31 = vld [vmem:[%s2886_s1 + $0x30] ss:$8 sps:$4 sm:$0xff]  }
  0x63   : > { %1006 = vmatpush1.bf16.msra.mxu1 %v2051_v24  ;;  %v2064_v32 = vld [vmem:[%s2886_s1 + $0x44] ss:$8 sps:$4 sm:$0xff]   ;;  %v2018_v33 = vld [vmem:[%s2886_s1 + $0x1a0] ss:$8 sps:$4 sm:$0xff]   ;;  %v2019_v34 = vld [vmem:[%s2886_s1 + $0x1b4] ss:$8 sps:$4 sm:$0xff]  }
  0x64   : > { %1007 = vmatprep.subr.bf16.mxu1 %v2052_v25  ;;  %v2069_v35 = vld [vmem:[%s2886_s1 + $0x40] ss:$8 sps:$4 sm:$0xff]   ;;  %v2070_v36 = vld [vmem:[%s2886_s1 + $0x54] ss:$8 sps:$4 sm:$0xff]   ;;  %v2021_v37 = vld [vmem:[%s2886_s1 + $0x1b0] ss:$8 sps:$4 sm:$0xff]  }
  0x65   : > { %1053 = vmatpush1.bf16.msra.mxu0 %v1997_v7  ;;  %v2022_v38 = vld [vmem:[%s2886_s1 + $0x1c4] ss:$8 sps:$4 sm:$0xff]   ;;  %v2075_v39 = vld [vmem:[%s2886_s1 + $0x50] ss:$8 sps:$4 sm:$0xff]   ;;  %v2024_v41 = vld [vmem:[%s2886_s1 + $0x1c0] ss:$8 sps:$4 sm:$0xff]  }
  0x66   : > { %1054 = vmatprep.subr.bf16.mxu0 %v1998_v8  ;;  %v2076_v40 = vld [vmem:[%s2886_s1 + $0x64] ss:$8 sps:$4 sm:$0xff]   ;;  %v2025_v42 = vld [vmem:[%s2886_s1 + $0x1d4] ss:$8 sps:$4 sm:$0xff]   ;;  %v2081_v43 = vld [vmem:[%s2886_s1 + $0x60] ss:$8 sps:$4 sm:$0xff]  }
  0x67   : > { %1008 = vmatpush1.bf16.msra.mxu1 %v2057_v27  ;;  %v2082_v44 = vld [vmem:[%s2886_s1 + $0x74] ss:$8 sps:$4 sm:$0xff]   ;;  %v2027_v45 = vld [vmem:[%s2886_s1 + $0x1d0] ss:$8 sps:$4 sm:$0xff]   ;;  %v2028_v46 = vld [vmem:[%s2886_s1 + $0x1e4] ss:$8 sps:$4 sm:$0xff]  }
  0x68   : > { %1009 = vmatprep.subr.bf16.mxu1 %v2058_v28  ;;  %v2087_v47 = vld [vmem:[%s2886_s1 + $0x70] ss:$8 sps:$4 sm:$0xff]   ;;  %v2088_v48 = vld [vmem:[%s2886_s1 + $0x84] ss:$8 sps:$4 sm:$0xff]   ;;  %v2030_v49 = vld [vmem:[%s2886_s1 + $0x1e0] ss:$8 sps:$4 sm:$0xff]  }
  0x69   : > { %1055 = vmatpush1.bf16.msra.mxu0 %v2000_v9  ;;  %v2031_v50 = vld [vmem:[%s2886_s1 + $0x1f4] ss:$8 sps:$4 sm:$0xff]   ;;  %v2093_v51 = vld [vmem:[%s2886_s1 + $0x80] ss:$8 sps:$4 sm:$0xff]   ;;  %v2033_v53 = vld [vmem:[%s2886_s1 + $0x1f0] ss:$8 sps:$4 sm:$0xff]  }
  0x6a   : > { %1056 = vmatprep.subr.bf16.mxu0 %v2001_v10  ;;  %v2094_v52 = vld [vmem:[%s2886_s1 + $0x94] ss:$8 sps:$4 sm:$0xff]   ;;  %v387_v55 = vld [vmem:[%s2482_s29 + $0x48] sm:$0xff]  ;;  %v2099_v57 = vld [vmem:[%s2886_s1 + $0x90] ss:$8 sps:$4 sm:$0xff]  }
  0x6b   : > { %1010 = vmatpush1.bf16.msra.mxu1 %v2063_v31  ;;  %v380_v54 = vld [vmem:[%s2482_s29 + $0x10] sm:$0xff]  ;;  %v2036_v56 = vld [vmem:[%s2886_s1 + $0x204] ss:$8 sps:$4 sm:$0xff]   ;;  %v2034_v58 = vld [vmem:[%s2886_s1 + $0x200] ss:$8 sps:$4 sm:$0xff]  }
  0x6c   : > { %1011 = vmatprep.subr.bf16.mxu1 %v2064_v32  ;;  %v394_v59 = vpack.c.bf16 %v387_v55, %v380_v54  ;;  %v2100_v60 = vld [vmem:[%s2886_s1 + $0xa4] ss:$8 sps:$4 sm:$0xff]   ;;  %v2039_v63 = vld [vmem:[%s2886_s1 + $0x214] ss:$8 sps:$4 sm:$0xff]   ;;  %v2105_v1 = vld [vmem:[%s2886_s1 + $0xa0] ss:$8 sps:$4 sm:$0xff]  }
  0x6d   : > { %1057 = vmatpush1.bf16.msra.mxu0 %v2003_v11  ;;  %v383_v61 = vld [vmem:[%s2482_s29 + $0x28] sm:$0xff]  ;;  %v390_v62 = vld [vmem:[%s2482_s29 + $0x60] sm:$0xff]  ;;  %v2106_v2 = vld [vmem:[%s2886_s1 + $0xb4] ss:$8 sps:$4 sm:$0xff]  }
  0x6e   : > { %1058 = vmatprep.subr.bf16.mxu0 %v2004_v12  ;;  %v397_v0 = vpack.c.bf16 %v390_v62, %v383_v61  ;;  %v2037_v3 = vld [vmem:[%s2886_s1 + $0x210] ss:$8 sps:$4 sm:$0xff]   ;;  %v2044_v4 = vld [vmem:[%s2886_s1 + $0x224] ss:$8 sps:$4 sm:$0xff]   ;;  %v2042_v10 = vld [vmem:[%s2886_s1 + $0x220] ss:$8 sps:$4 sm:$0xff]  }
  0x6f   : > { %1012 = vmatpush1.bf16.msra.mxu1 %v2069_v35  ;;  %v379_v5 = vld [vmem:[%s2482_s29 + $0x8] sm:$0xff]  ;;  %v386_v6 = vld [vmem:[%s2482_s29 + $0x40] sm:$0xff]  ;;  %v2111_v7 = vld [vmem:[%s2886_s1 + $0xb0] ss:$8 sps:$4 sm:$0xff]   ;;  %v2276_v61 = vmov 0  }
  0x70   : > { %1013 = vmatprep.subr.bf16.mxu1 %v2070_v36  ;;  %v393_v8 = vpack.c.bf16 %v386_v6, %v379_v5  ;;  %v2112_v9 = vld [vmem:[%s2886_s1 + $0xc4] ss:$8 sps:$4 sm:$0xff]   ;;  %v2050_v11 = vld [vmem:[%s2886_s1 + $0x234] ss:$8 sps:$4 sm:$0xff]   ;;  %v2117_v12 = vld [vmem:[%s2886_s1 + $0xc0] ss:$8 sps:$4 sm:$0xff]  }
  0x71   : > { %1059 = vmatpush1.bf16.msra.mxu0 %v2006_v16  ;;  %v2118_v13 = vld [vmem:[%s2886_s1 + $0xd4] ss:$8 sps:$4 sm:$0xff]   ;;  %v2048_v14 = vld [vmem:[%s2886_s1 + $0x230] ss:$8 sps:$4 sm:$0xff]   ;;  %v2056_v15 = vld [vmem:[%s2886_s1 + $0x244] ss:$8 sps:$4 sm:$0xff]  }
  0x72   : > { %1060 = vmatprep.subr.bf16.mxu0 %v2007_v17  ;;  %1035 = vmatprep.mubr.bf16.mxu1 %v393_v8  ;;  %v2054_v16 = vld [vmem:[%s2886_s1 + $0x240] ss:$8 sps:$4 sm:$0xff]   ;;  %v2123_v17 = vld [vmem:[%s2886_s1 + $0xd0] ss:$8 sps:$4 sm:$0xff]   ;;  %v2062_v18 = vld [vmem:[%s2886_s1 + $0x254] ss:$8 sps:$4 sm:$0xff]  }
  0x73   : > { %1014 = vmatpush1.bf16.msra.mxu1 %v2075_v39  ;;  %v2130_v21 = vld [vmem:[%s2886_s1 + $0xf4] ss:$8 sps:$4 sm:$0xff]   ;;  %v2060_v22 = vld [vmem:[%s2886_s1 + $0x250] ss:$8 sps:$4 sm:$0xff]   ;;  %v378_v25 = vld [vmem:[%s2482_s29] sm:$0xff]  ;;  %v2277_v8 = vmov 0.0  }
  0x74   : > { %1015 = vmatprep.subr.bf16.mxu1 %v2076_v40  ;;  %v2132_v24 = vld [vmem:[%s2886_s1 + $0xf0] ss:$8 sps:$4 sm:$0xff]   ;;  %v2133_v27 = vld [vmem:[%s2888_s3 + $0x40] sm:$0xff]   ;;  %v2135_v32 = vld [vmem:[%s2888_s3 + $0x48] sm:$0xff]  }
  0x75   : > { %1061 = vmatpush1.bf16.msra.mxu0 %v2009_v19  ;;  %v2124_v19 = vld [vmem:[%s2886_s1 + $0xe4] ss:$8 sps:$4 sm:$0xff]   ;;  %v2066_v28 = vld [vmem:[%s2886_s1 + $0x260] ss:$8 sps:$4 sm:$0xff]   ;;  %v2137_v36 = vld [vmem:[%s2888_s3 + $0x50] sm:$0xff]  }
  0x76   : > { %1062 = vmatprep.subr.bf16.mxu0 %v2010_v20  ;;  %v2129_v20 = vld [vmem:[%s2886_s1 + $0xe0] ss:$8 sps:$4 sm:$0xff]   ;;  %v2138_v39 = vld [vmem:[%s2888_s3 + $0x10] sm:$0xff]   ;;  %v2139_v40 = vld [vmem:[%s2888_s3 + $0x58] sm:$0xff]  }
  0x77   : > { %1016 = vmatpush1.bf16.msra.mxu1 %v2081_v43  ;;  %v2136_v35 = vld [vmem:[%s2888_s3 + $0x8] sm:$0xff]   ;;  %v2140_v43 = vld [vmem:[%s2888_s3 + $0x18] sm:$0xff]   ;;  %v384_v62 = vld [vmem:[%s2482_s29 + $0x30] sm:$0xff] }
  0x78   : > { %1017 = vmatprep.subr.bf16.mxu1 %v2082_v44  ;;  %v2141_v44 = vld [vmem:[%s2888_s3 + $0x60] sm:$0xff]   ;;  %v2122_v54 = vld [vmem:[%s2886_s1 + $0x2f4] ss:$8 sps:$4 sm:$0xff]   ;;  %v2120_v55 = vld [vmem:[%s2886_s1 + $0x2f0] ss:$8 sps:$4 sm:$0xff]  }
  0x79   : > { %1063 = vmatpush1.bf16.msra.mxu0 %v2012_v23  ;;  %v2068_v23 = vld [vmem:[%s2886_s1 + $0x264] ss:$8 sps:$4 sm:$0xff]   ;;  %v2146_v5 = vld [vmem:[%s2888_s3 + $0x30] sm:$0xff]   ;;  %v2147_v6 = vld [vmem:[%s2888_s3 + $0x78] sm:$0xff]  }
  0x7a   : > { %1064 = vmatprep.subr.bf16.mxu0 %v2013_v26  ;;  %v385_v26 = vld [vmem:[%s2482_s29 + $0x38] sm:$0xff] }
  0x7b   : > { %1018 = vmatpush1.bf16.msra.mxu1 %v2087_v47  ;;  %v392_v31 = vpack.c.bf16 %v385_v26, %v378_v25  ;;  %v2096_v47 = vld [vmem:[%s2886_s1 + $0x2b0] ss:$8 sps:$4 sm:$0xff]  }
  0x7c   : > { %1019 = vmatprep.subr.bf16.mxu1 %v2088_v48  ;;  %v2104_v48 = vld [vmem:[%s2886_s1 + $0x2c4] ss:$8 sps:$4 sm:$0xff]  }
  0x7d   : > { %1065 = vmatpush1.bf16.msra.mxu0 %v2015_v29  ;;  %v2074_v29 = vld [vmem:[%s2886_s1 + $0x274] ss:$8 sps:$4 sm:$0xff]  }
  0x7e   : > { %1066 = vmatprep.subr.bf16.mxu0 %v2016_v30  ;;  %v2134_v30 = vld [vmem:[%s2888_s3] sm:$0xff]  }
  0x7f   : > { %1020 = vmatpush1.bf16.msra.mxu1 %v2093_v51  ;;  %v2108_v51 = vld [vmem:[%s2886_s1 + $0x2d0] ss:$8 sps:$4 sm:$0xff]  }
  0x80   : > { %1021 = vmatprep.subr.bf16.mxu1 %v2094_v52  ;;  %v2116_v52 = vld [vmem:[%s2886_s1 + $0x2e4] ss:$8 sps:$4 sm:$0xff]  }
  0x81   : > { %1067 = vmatpush1.bf16.msra.mxu0 %v2018_v33  ;;  %v2072_v33 = vld [vmem:[%s2886_s1 + $0x270] ss:$8 sps:$4 sm:$0xff]  }
  0x82   : > { %1068 = vmatprep.subr.bf16.mxu0 %v2019_v34  ;;  %v2080_v34 = vld [vmem:[%s2886_s1 + $0x284] ss:$8 sps:$4 sm:$0xff]  }
  0x83   : > { %1022 = vmatpush1.bf16.msra.mxu1 %v2099_v57  ;;  %v389_v57 = vld [vmem:[%s2482_s29 + $0x58] sm:$0xff] }
  0x84   : > { %1023 = vmatprep.subr.bf16.mxu1 %v2100_v60  ;;  %v2126_v60 = vld [vmem:[%s2886_s1 + $0x300] ss:$8 sps:$4 sm:$0xff]  }
  0x85   : > { %1069 = vmatpush1.bf16.msra.mxu0 %v2021_v37  ;;  %v2078_v37 = vld [vmem:[%s2886_s1 + $0x280] ss:$8 sps:$4 sm:$0xff]  }
  0x86   : > { %1070 = vmatprep.subr.bf16.mxu0 %v2022_v38  ;;  %v2086_v38 = vld [vmem:[%s2886_s1 + $0x294] ss:$8 sps:$4 sm:$0xff]  }
  0x87   : > { %1024 = vmatpush1.bf16.msra.mxu1 %v2105_v1  ;;  %v2142_v1 = vld [vmem:[%s2888_s3 + $0x20] sm:$0xff]  }
  0x88   : > { %1025 = vmatprep.subr.bf16.mxu1 %v2106_v2  ;;  %v2143_v2 = vld [vmem:[%s2888_s3 + $0x68] sm:$0xff]  }
  0x89   : > { %1071 = vmatpush1.bf16.msra.mxu0 %v2024_v41  ;;  %v2084_v41 = vld [vmem:[%s2886_s1 + $0x290] ss:$8 sps:$4 sm:$0xff]  }
  0x8a   : > { %1072 = vmatprep.subr.bf16.mxu0 %v2025_v42  ;;  %v2092_v42 = vld [vmem:[%s2886_s1 + $0x2a4] ss:$8 sps:$4 sm:$0xff]  }
  0x8b   : > { %1026 = vmatpush1.bf16.msra.mxu1 %v2111_v7  ;;  %v2148_v7 = vld [vmem:[%s2888_s3 + $0x38] sm:$0xff]  }
  0x8c   : > { %1027 = vmatprep.subr.bf16.mxu1 %v2112_v9 }
  0x8d   : > { %1073 = vmatpush1.bf16.msra.mxu0 %v2027_v45  ;;  %v2090_v45 = vld [vmem:[%s2886_s1 + $0x2a0] ss:$8 sps:$4 sm:$0xff]  }
  0x8e   : > { %1074 = vmatprep.subr.bf16.mxu0 %v2028_v46  ;;  %v2098_v46 = vld [vmem:[%s2886_s1 + $0x2b4] ss:$8 sps:$4 sm:$0xff]  }
  0x8f   : > { %1028 = vmatpush1.bf16.msra.mxu1 %v2117_v12 }
  0x90   : > { %1029 = vmatprep.subr.bf16.mxu1 %v2118_v13  ;;  %v499_v13 = vlaneseq }
  0x91   : > { %1075 = vmatpush1.bf16.msra.mxu0 %v2030_v49  ;;  %v2102_v49 = vld [vmem:[%s2886_s1 + $0x2c0] ss:$8 sps:$4 sm:$0xff]  }
  0x92   : > { %1076 = vmatprep.subr.bf16.mxu0 %v2031_v50  ;;  %v2110_v50 = vld [vmem:[%s2886_s1 + $0x2d4] ss:$8 sps:$4 sm:$0xff]  }
  0x93   : > { %1030 = vmatpush1.bf16.msra.mxu1 %v2123_v17 }
  0x94   : > { %1031 = vmatprep.subr.bf16.mxu1 %v2124_v19 }
  0x95   : > { %1077 = vmatpush1.bf16.msra.mxu0 %v2033_v53  ;;  %v2114_v53 = vld [vmem:[%s2886_s1 + $0x2e0] ss:$8 sps:$4 sm:$0xff]  }
  0x96   : > { %1089 = vmatprep.subr.bf16.mxu0 %v2036_v56  ;;  %v382_v56 = vld [vmem:[%s2482_s29 + $0x20] sm:$0xff] }
  0x97   : > { %1032 = vmatpush1.bf16.msra.mxu1 %v2129_v20 }
  0x98   : > { %1079 = vmatmul.mubr.bf16.vlgmr.msra.gmra.mrb[0].mxu0 %v394_v59  ;;  %1033 = vmatprep.subr.bf16.mxu1 %v2130_v21  ;;  %v396_v59 = vpack.c.bf16 %v389_v57, %v382_v56  ;;  %v2157_v57 = vld [vmem:[%s2892_s7] sm:$0xff]  }
  0x99   : > { %1090 = vmatpush1.bf16.msra.mxu0 %v2034_v58  ;;  %1121 = vmatprep.mubr.bf16.mxu0 %v397_v0  ;;  %v2128_v58 = vld [vmem:[%s2886_s1 + $0x304] ss:$8 sps:$4 sm:$0xff]  }
  0x9a   : > { %1091 = vmatprep.subr.bf16.mxu0 %v2039_v63  ;;  %v391_v63 = vld [vmem:[%s2482_s29 + $0x68] sm:$0xff] }
  0x9b   : > { %1034 = vmatpush1.bf16.msra.mxu1 %v2132_v24  ;;  %v398_v0 = vpack.c.bf16 %v391_v63, %v384_v62  ;;  %v2161_v62 = vld [vmem:[%s2892_s7 + $0x20] sm:$0xff]   ;;  %v2162_v63 = vld [vmem:[%s2892_s7 + $0x28] sm:$0xff]  }
  0x9c   : > { %1847 = vmatprep.subr.bf16.mxu1 %v2133_v27 }
  0x9d   : > { %1092 = vmatpush1.bf16.msra.mxu0 %v2037_v3  ;;  %v2144_v3 = vld [vmem:[%s2888_s3 + $0x28] sm:$0xff]  }
  0x9e   : > { %1093 = vmatprep.subr.bf16.mxu0 %v2044_v4  ;;  %1036 = vmatmul.mubr.bf16.vlgmr.msra.gmra.mrb[0].mxu1 %v392_v31  ;;  %v2145_v4 = vld [vmem:[%s2888_s3 + $0x70] sm:$0xff]  }
  0x9f   : > { %1848 = vmatpush3.bf16.msra.mxu1 %v2134_v30 }
  0xa0   : > { %1849 = vmatprep.subr.bf16.mxu1 %v2135_v32 }
  0xa1   : > { %1094 = vmatpush1.bf16.msra.mxu0 %v2042_v10 }
  0xa2   : > { %1095 = vmatprep.subr.bf16.mxu0 %v2050_v11 }
  0xa3   : > { %1850 = vmatpush3.bf16.msra.mxu1 %v2136_v35 }
  0xa4   : > { %1851 = vmatprep.subr.bf16.mxu1 %v2137_v36 }
  0xa5   : > { %1096 = vmatpush1.bf16.msra.mxu0 %v2048_v14  ;;  %v500_v14 = vshrl.u32 %v499_v13, 7  ;;  %v1836_v13 = vld [vmem:[#allocation6] ss:$0 sm:$0xff] }
  0xa6   : > { %1097 = vmatprep.subr.bf16.mxu0 %v2056_v15 }
  0xa7   : > { %1852 = vmatpush3.bf16.msra.mxu1 %v2138_v39  ;;  %v501_v15 = vsub.s32 0, %v500_v14  ;;  %v505_v17 = vsub.s32 1, %v500_v14  ;;  %v2150_v39 = vld [vmem:[%s2890_s5 + $0x8] sm:$0xff]  }
  0xa8   : > { %1853 = vmatprep.subr.bf16.mxu1 %v2139_v40  ;;  %v2151_v40 = vld [vmem:[%s2890_s5 + $0x10] sm:$0xff]  }
  0xa9   : > { %1098 = vmatpush1.bf16.msra.mxu0 %v2054_v16  ;;  %v497_v16 = vld [vmem:[%s2887_s2] sm:$0x3] }
  0xaa   : > { %1099 = vmatprep.subr.bf16.mxu0 %v2062_v18  ;;  %v502_v18 = vrot.slane %v497_v16, %v501_v15  ;;  %v506_v19 = vrot.slane %v497_v16, %v505_v17 }
  0xab   : > { %1854 = vmatpush3.bf16.msra.mxu1 %v2140_v43  ;;  %v2154_v43 = vld [vmem:[%s2890_s5 + $0x28] sm:$0xff]  }
  0xac   : > { %1855 = vmatprep.subr.bf16.mxu1 %v2141_v44  ;;  %v2155_v44 = vld [vmem:[%s2890_s5 + $0x30] sm:$0xff]  }
  0xad   : > { %1100 = vmatpush1.bf16.msra.mxu0 %v2060_v22 }
  0xae   : > { %1101 = vmatprep.subr.bf16.mxu0 %v2068_v23 }
  0xaf   : > { %1856 = vmatpush3.bf16.msra.mxu1 %v2142_v1  ;;  %v2164_v1 = vld [vmem:[%s2892_s7 + $0x38] sm:$0xff]  }
  0xb0   : > { %1857 = vmatprep.subr.bf16.mxu1 %v2143_v2  ;;  %v1827_v2 = vld [vmem:[#allocation4] ss:$0 sm:$0xff] }
  0xb1   : > { %1102 = vmatpush1.bf16.msra.mxu0 %v2066_v28 }
  0xb2   : > { %1103 = vmatprep.subr.bf16.mxu0 %v2074_v29 }
  0xb3   : > { %1858 = vmatpush3.bf16.msra.mxu1 %v2144_v3 }
  0xb4   : > { %1859 = vmatprep.subr.bf16.mxu1 %v2145_v4 }
  0xb5   : > { %1104 = vmatpush1.bf16.msra.mxu0 %v2072_v33 }
  0xb6   : > { %1105 = vmatprep.subr.bf16.mxu0 %v2080_v34 }
  0xb7   : > { %1860 = vmatpush3.bf16.msra.mxu1 %v2146_v5 }
  0xb8   : > { %1861 = vmatprep.subr.bf16.mxu1 %v2147_v6 }
  0xb9   : > { %1106 = vmatpush1.bf16.msra.mxu0 %v2078_v37 }
  0xba   : > { %1107 = vmatprep.subr.bf16.mxu0 %v2086_v38  ;;  %v2149_v38 = vld [vmem:[%s2890_s5] sm:$0xff]  }
  0xbb   : > { %1862 = vmatpush3.bf16.msra.mxu1 %v2148_v7 }
  0xbc   : > { %1887 = vmatprep.subr.bf16.mxu1 %v2277_v8 }
  0xbd   : > { %1108 = vmatpush1.bf16.msra.mxu0 %v2084_v41  ;;  %v2152_v41 = vld [vmem:[%s2890_s5 + $0x18] sm:$0xff]  }
  0xbe   : > { %1109 = vmatprep.subr.bf16.mxu0 %v2092_v42  ;;  %v2153_v42 = vld [vmem:[%s2890_s5 + $0x20] sm:$0xff]  }
  0xc1   : > { %1110 = vmatpush1.bf16.msra.mxu0 %v2090_v45  ;;  %v2156_v45 = vld [vmem:[%s2890_s5 + $0x38] sm:$0xff]  }
  0xc2   : > { %1111 = vmatprep.subr.bf16.mxu0 %v2098_v46 }
  0xc5   : > { %1112 = vmatpush1.bf16.msra.mxu0 %v2096_v47  ;;  %v1810_v47 = vld [vmem:[#allocation2] ss:$0 sm:$0xff] }
  0xc6   : > { %1113 = vmatprep.subr.bf16.mxu0 %v2104_v48 }
  0xc9   : > { %1114 = vmatpush1.bf16.msra.mxu0 %v2102_v49 }
  0xca   : > { %1115 = vmatprep.subr.bf16.mxu0 %v2110_v50 }
  0xcd   : > { %1116 = vmatpush1.bf16.msra.mxu0 %v2108_v51 }
  0xce   : > { %1117 = vmatprep.subr.bf16.mxu0 %v2116_v52 }
  0xd1   : > { %1118 = vmatpush1.bf16.msra.mxu0 %v2114_v53 }
  0xd2   : > { %1119 = vmatprep.subr.bf16.mxu0 %v2122_v54 }
  0xd5   : > { %1120 = vmatpush1.bf16.msra.mxu0 %v2120_v55 }
  0xd6   : > { %1132 = vmatprep.subr.bf16.mxu0 %v2128_v58 }
  0xd8   : > { %1122 = vmatmul.mubr.bf16.vlgmr.msra.gmra.mrb[0].mxu0 %v396_v59  ;;  %v2158_v59 = vld [vmem:[%s2892_s7 + $0x8] sm:$0xff]  }
  0xd9   : > { %1133 = vmatpush1.bf16.msra.mxu0 %v2126_v60  ;;  %1164 = vmatprep.mubr.bf16.mxu0 %v2276_v61  ;;  %v2159_v60 = vld [vmem:[%s2892_s7 + $0x10] sm:$0xff]   ;;  %v2160_v61 = vld [vmem:[%s2892_s7 + $0x18] sm:$0xff]  }
  0xe4   : > { %1809 = vmatmul.mubr.msk.bf16.vlgmr.msra.gmra.mrb[0].mxu0 %vm999_vm0, %v398_v0  ;;  %v2163_v0 = vld [vmem:[%s2892_s7 + $0x30] sm:$0xff]  }
 0x171   : > { %v1037_v9 = vpop.f32.mrb[0].mxu1 }
 0x172   : > { %v1039_v10 = vpop.f32.mrb[1].mxu1  ;;  %v1038_v20 = vadd.f32 %v1037_v9, %v502_v18 }
 0x173   : > { %v1041_v11 = vpop.f32.mrb[2].mxu1  ;;  %v1040_v21 = vadd.f32 %v1039_v10, %v506_v19 }
 0x174   : > { %v1043_v12 = vpop.f32.mrb[3].mxu1  ;;  %v1042_v23 = vadd.f32 %v1041_v11, %v502_v18 }
 0x175   : > { %v1044_v26 = vadd.f32 %v1043_v12, %v506_v19 }
 0x1b7   : > { %v1166_v22 = vpop.f32.mrb[0].mxu0 }
 0x1b8   : > { %v1928_v24 = vadd.f32 %v1166_v22, %v1038_v20  ;;  %v1168_v25 = vpop.f32.mrb[1].mxu0 }
 0x1b9   : > { %v1930_v27 = vadd.f32 %v1168_v25, %v1040_v21  ;;  %v1170_v28 = vpop.f32.mrb[2].mxu0 }
 0x1ba   : > { %v1932_v29 = vadd.f32 %v1170_v28, %v1042_v23  ;;  %v1172_v30 = vpop.f32.mrb[3].mxu0  ;;  %v1175_v32 = vmax.f32 %v1928_v24, 0.0 }
 0x1bb   : > { %v1934_v31 = vadd.f32 %v1172_v30, %v1044_v26  ;;  %v1176_v34 = vmax.f32 %v1930_v27, 0.0 }
 0x1bc   : > { %v1177_v33 = vmax.f32 %v1932_v29, 0.0 }
 0x1bd   : > { %v1178_v35 = vmax.f32 %v1934_v31, 0.0 }
 0x1be   : > { %v1179_v36 = vpack.c.bf16 %v1177_v33, %v1175_v32 }
 0x1bf   : > { %v1180_v37 = vpack.c.bf16 %v1178_v35, %v1176_v34 }
 0x1c1   : > { %1348 = vmatprep.mubr.bf16.mxu1 %v1180_v37 }
 0x1c2   : > { %1349 = vmatmul.mubr.bf16.vlgmr.msra.gmra.mrb[4].mxu1 %v1179_v36 }
 0x1c3   : > { %1888 = vmatpush3.bf16.msra.mxu1 %v2149_v38  ;;  %1903 = vmatprep.mubr.msk.bf16.mxu1 %vm2278_vm1, %v2277_v8 }
 0x1c4   : > { %1889 = vmatprep.subr.bf16.mxu1 %v2277_v8 }
 0x1c7   : > { %1890 = vmatpush3.bf16.msra.mxu1 %v2150_v39 }
 0x1c8   : > { %1891 = vmatprep.subr.bf16.mxu1 %v2277_v8 }
 0x1cb   : > { %1892 = vmatpush3.bf16.msra.mxu1 %v2151_v40 }
 0x1cc   : > { %1893 = vmatprep.subr.bf16.mxu1 %v2277_v8 }
 0x1cf   : > { %1894 = vmatpush3.bf16.msra.mxu1 %v2152_v41 }
 0x1d0   : > { %1895 = vmatprep.subr.bf16.mxu1 %v2277_v8 }
 0x1d3   : > { %1896 = vmatpush3.bf16.msra.mxu1 %v2153_v42 }
 0x1d4   : > { %1897 = vmatprep.subr.bf16.mxu1 %v2277_v8 }
 0x1d7   : > { %1898 = vmatpush3.bf16.msra.mxu1 %v2154_v43 }
 0x1d8   : > { %1899 = vmatprep.subr.bf16.mxu1 %v2277_v8 }
 0x1db   : > { %1900 = vmatpush3.bf16.msra.mxu1 %v2155_v44 }
 0x1dc   : > { %1901 = vmatprep.subr.bf16.mxu1 %v2277_v8 }
 0x1df   : > { %1902 = vmatpush3.bf16.msra.mxu1 %v2156_v45 }
 0x1e0   : > { %1907 = vmatprep.subr.bf16.mxu1 %v2277_v8 }
 0x295   : > { %v1863_v46 = vpop.f32.mrb[4].mxu1 }
 0x296   : > { %v1864_v48 = vpop.f32.mrb[5].mxu1 }
 0x297   : > { %v1865_v49 = vadd.f32 %v1864_v48, %v1863_v46  ;;  %v1866_v50 = vpop.f32.mrb[6].mxu1 }
 0x298   : > { %v1867_v51 = vpop.f32.mrb[7].mxu1 }
 0x299   : > { %v1351_v52 = vadd.f32 %v1865_v49, %v1810_v47  ;;  %v1868_v53 = vadd.f32 %v1867_v51, %v1866_v50 }
 0x29b   : > { %v1354_v54 = vadd.f32 %v1868_v53, %v1810_v47  ;;  %v1357_v55 = vmax.f32 %v1351_v52, 0.0 }
 0x29d   : > { %v1358_v56 = vmax.f32 %v1354_v54, 0.0 }
 0x29f   : > { %v1359_v58 = vpack.c.bf16 %v1358_v56, %v1357_v55 }
 0x2a1   : > { %1904 = vmatmul.mubr.bf16.vlgmr.msra.gmra.mrb[8].mxu1 %v1359_v58 }
 0x2a2   : > { %1908 = vmatpush3.bf16.msra.mxu1 %v2157_v57  ;;  %1923 = vmatprep.mubr.msk.bf16.mxu1 %vm2278_vm1, %v2277_v8 }
 0x2a3   : > { %1909 = vmatprep.subr.bf16.mxu1 %v2277_v8 }
 0x2a6   : > { %1910 = vmatpush3.bf16.msra.mxu1 %v2158_v59 }
 0x2a7   : > { %1911 = vmatprep.subr.bf16.mxu1 %v2277_v8 }
 0x2aa   : > { %1912 = vmatpush3.bf16.msra.mxu1 %v2159_v60 }
 0x2ab   : > { %1913 = vmatprep.subr.bf16.mxu1 %v2277_v8 }
 0x2ae   : > { %1914 = vmatpush3.bf16.msra.mxu1 %v2160_v61 }
 0x2af   : > { %1915 = vmatprep.subr.bf16.mxu1 %v2277_v8 }
 0x2b2   : > { %1916 = vmatpush3.bf16.msra.mxu1 %v2161_v62 }
 0x2b3   : > { %1917 = vmatprep.subr.bf16.mxu1 %v2277_v8 }
 0x2b6   : > { %1918 = vmatpush3.bf16.msra.mxu1 %v2162_v63 }
 0x2b7   : > { %1919 = vmatprep.subr.bf16.mxu1 %v2277_v8 }
 0x2ba   : > { %1920 = vmatpush3.bf16.msra.mxu1 %v2163_v0 }
 0x2bb   : > { %1921 = vmatprep.subr.bf16.mxu1 %v2277_v8 }
 0x2be   : > { %1922 = vmatpush3.bf16.msra.mxu1 %v2164_v1 }
 0x374   : > { %v1465_v3 = vpop.f32.mrb[8].mxu1 }
 0x375   : > { %v1466_v4 = vadd.f32 %v1827_v2, %v1465_v3  ;;  %v1905_v5 = vpop.f32.mrb[9].mxu1 }
 0x376   : > { %v1468_v6 = vpop.f32.mrb[10].mxu1 }
 0x377   : > { %v1469_v7 = vadd.f32 %v1827_v2, %v1468_v6  ;;  %v1906_v9 = vpop.f32.mrb[11].mxu1  ;;  %v1472_v10 = vmax.f32 %v1466_v4, 0.0 }
 0x379   : > { %v1473_v11 = vmax.f32 %v1469_v7, 0.0 }
 0x37b   : > { %v1474_v12 = vpack.c.bf16 %v1473_v11, %v1472_v10 }
 0x37d   : > { %1924 = vmatmul.mubr.bf16.vlgmr.msra.gmra.mrb[12].mxu1 %v1474_v12 }
 0x450   : > { %v1580_v14 = vpop.f32.mrb[12].mxu1 }
 0x451   : > { %v1581_v15 = vadd.f32 %v1836_v13, %v1580_v14  ;;  %v1925_v8 = vpop.f32.mrb[13].mxu1 }
 0x452   : > { %v1583_v16 = vpop.f32.mrb[14].mxu1 }
 0x453   : > { %1587 = vmax.xlane.f32.xlu0 %v1581_v15  ;;  %v1926_v17 = vpop.f32.mrb[15].mxu1  ;;  %v1584_v18 = vadd.f32 %v1836_v13, %v1583_v16 }
 0x457   : > { %1589 = vmax.xlane.f32.xlu0 %v1584_v18 }
 0x4e0   : > { %v1588_v19 = vpop.xlane.xlu0 %1587 }
 0x4e1   : > { %v1591_v20 = vsub.f32 %v1581_v15, %v1588_v19 }
 0x4e3   : > { %v1593_v21 = vmul.f32 1.442695, %v1591_v20 }
 0x4e4   : > { %v1590_v22 = vpop.xlane.xlu0 %1589 }
 0x4e5   : > { %v1592_v23 = vsub.f32 %v1584_v18, %v1590_v22  ;;  %2165 = vpow2.f32 %v1593_v21 }
 0x4e7   : > { %v1595_v24 = vmul.f32 1.442695, %v1592_v23 }
 0x4e9   : > { %2167 = vpow2.f32 %v1595_v24 }
 0x4ef   : > { %v2166_v25 = vpop.eup %2165 }
 0x4f0   : > { %1597 = vadd.xlane.f32.xlu1 %v2166_v25 }
 0x4f3   : > { %v2168_v26 = vpop.eup %2167 }
 0x4f4   : > { %1599 = vadd.xlane.f32.xlu1 %v2168_v26 }
 0x57d   : > { %v1598_v27 = vpop.xlane.xlu1 %1597 }
 0x57e   : > { %2169 = vlog2.f32 %v1598_v27 }
 0x581   : > { %v1600_v28 = vpop.xlane.xlu1 %1599 }
 0x582   : > { %2171 = vlog2.f32 %v1600_v28 }
 0x588   : > { %v2170_v29 = vpop.eup %2169 }
 0x589   : > { %v1602_v30 = vmul.f32 0.6931472, %v2170_v29 }
 0x58b   : > { %v1605_v31 = vsub.f32 %v1591_v20, %v1602_v30 }
 0x58c   : > { %v2172_v32 = vpop.eup %2171 }
 0x58d   : > { %1607 = vst [vmem:[%s375_s23] sm:$0xff] %v1605_v31  ;;  %v1604_v33 = vmul.f32 0.6931472, %v2172_v32 }
 0x58f   : > { %v1606_v34 = vsub.f32 %v1592_v23, %v1604_v33 }
 0x591   : > { %1608 = vst [vmem:[%s375_s23 + $0x8] sm:$0xff] %v1606_v34 }
 0x592 PF: > { %s21_s30 = sadd.s32 1, %s2271_s30  }
 0x593   : > { %p18_p8 = scmp.ge.s32.totalorder %s21_s30, 4  }
 0x595   :  { %20 = sbr.rel (!%p18_p8) target bundleno = 2 (0x2), region = 99 }
 0x59c   :  { %1631 = vsyncpa [#allocation3], 1 }
 0x59d   :  { %1633 = vsyncpa [#allocation3 + $0x1], 1 }
 0x59e   :  { %1634 = vsyncpa [#allocation5], 1 }

</bundles_post_ra>
